<compile_context>
chip_gen: v7x
topology: tpu7x:2x2x1
jax: 0.10.0
libtpu: 0.0.40
codegen_flags: <defaults>
</compile_context>

<pallas_src>
import jax
import jax.numpy as jnp
from jax.experimental import pallas as pl
from jax.experimental.pallas import tpu as pltpu


def _round_up(x, m):
    return -(-x // m) * m


def _base_transform_kernel(x_ref, wls_ref, bls_ref, wsh_ref, bsh_ref,
                           ls_ref, sh_ref):
    # x_ref:   (tm, in_dim)
    # wls_ref: (in_dim, out_dim)   log-scale projection weights (pre-transposed)
    # bls_ref: (1, out_dim)
    # wsh_ref: (in_dim, out_dim)   shift projection weights (pre-transposed)
    # bsh_ref: (1, out_dim)
    # ls_ref:  (tm, out_dim)       log_scale output
    # sh_ref:  (tm, out_dim)       shift output
    x = x_ref[...]
    ls = jnp.dot(x, wls_ref[...], preferred_element_type=jnp.float32) + bls_ref[...]
    sh = jnp.dot(x, wsh_ref[...], preferred_element_type=jnp.float32) + bsh_ref[...]
    ls_ref[...] = ls.astype(ls_ref.dtype)
    sh_ref[...] = sh.astype(sh_ref.dtype)


def prepare_base_transform_params(w_log_scale, b_log_scale, w_shift, b_shift):
    """One-time parameter prep (call at init, NOT per forward).

    Transposes PyTorch (out_dim, in_dim) weights to (in_dim, out_dim) so the
    kernel matmul is a plain x @ W, and reshapes biases to (1, out_dim) for a
    lane-major layout that broadcasts cheaply inside the kernel.
    """
    out_dim, _ = w_log_scale.shape
    return (w_log_scale.T, b_log_scale.reshape(1, out_dim),
            w_shift.T, b_shift.reshape(1, out_dim), out_dim)


def _choose_tm(M, in_dim, out_dim, itemsize):
    """Row-tile selection.

    Big tiles amortize the ~0.35us per-grid-step pipeline overhead (this kernel
    is pure HBM streaming), but we keep >= 2 tiles so the 'parallel' grid axis
    can be sharded across both v7x TensorCores, and cap the double-buffered
    VMEM footprint at ~24 MiB (fits v7x's 64 MiB physical VMEM with headroom,
    and v5e/v6e trivially).
    """
    sublane = max(8, 32 // itemsize)          # 8 for f32, 16 for bf16
    if M <= sublane:
        return M                              # single full-extent block

    tm_max = 4096
    # Double-buffered bytes per row (VMEM lane-pads the minor dim to 128).
    row_bytes = (_round_up(in_dim, 128) + 2 * _round_up(out_dim, 128)) * itemsize
    budget = 24 * 1024 * 1024
    tm_budget = max(sublane, (budget // (2 * row_bytes)) // sublane * sublane)

    tm = min(tm_max, tm_budget, -(-M // 2))   # at least 2 tiles when possible
    tm = _round_up(tm, sublane)
    return tm


def base_transform(condition_inputs, w_ls_t, b_ls, w_sh_t, b_sh, out_dim):
    """
    condition_inputs: (batch, seq, in_dim)
    w_ls_t / w_sh_t:  (in_dim, out_dim) pre-transposed weights
    b_ls / b_sh:      (1, out_dim) biases
    Returns: (log_scale, shift), each (batch, seq, out_dim)
    """
    batch, seq, in_dim = condition_inputs.shape
    M = batch * seq
    dtype = condition_inputs.dtype
    itemsize = jnp.dtype(dtype).itemsize

    tm = _choose_tm(M, in_dim, out_dim, itemsize)
    num_tiles = pl.cdiv(M, tm)

    x2d = condition_inputs.reshape(M, in_dim)   # no row padding; Pallas masks edge

    # True (lane-padded) double-buffered VMEM footprint, with ~1.5x headroom.
    tile_bytes = tm * (_round_up(in_dim, 128) + 2 * _round_up(out_dim, 128)) * itemsize
    param_bytes = 2 * (_round_up(in_dim, 8) * _round_up(out_dim, 128)
                       + 8 * _round_up(out_dim, 128)) * itemsize
    footprint = 2 * tile_bytes + 2 * param_bytes
    vmem_limit = int(min(max(footprint * 3 // 2, 16 * 1024 * 1024),
                         48 * 1024 * 1024))

    cost = pl.CostEstimate(
        flops=2 * M * in_dim * (2 * out_dim),
        transcendentals=0,
        bytes_accessed=itemsize * (M * in_dim + 2 * in_dim * out_dim
                                   + 2 * out_dim + 2 * M * out_dim),
    )

    ls2d, sh2d = pl.pallas_call(
        _base_transform_kernel,
        out_shape=(jax.ShapeDtypeStruct((M, out_dim), dtype),
                   jax.ShapeDtypeStruct((M, out_dim), dtype)),
        grid_spec=pltpu.PrefetchScalarGridSpec(
            num_scalar_prefetch=0,
            grid=(num_tiles,),
            in_specs=[
                pl.BlockSpec((tm, in_dim), lambda i: (i, 0)),        # x tile
                pl.BlockSpec((in_dim, out_dim), lambda i: (0, 0)),   # w_ls (invariant)
                pl.BlockSpec((1, out_dim), lambda i: (0, 0)),        # b_ls (invariant)
                pl.BlockSpec((in_dim, out_dim), lambda i: (0, 0)),   # w_sh (invariant)
                pl.BlockSpec((1, out_dim), lambda i: (0, 0)),        # b_sh (invariant)
            ],
            out_specs=[
                pl.BlockSpec((tm, out_dim), lambda i: (i, 0)),       # log_scale
                pl.BlockSpec((tm, out_dim), lambda i: (i, 0)),       # shift
            ],
        ),
        compiler_params=pltpu.CompilerParams(
            dimension_semantics=("parallel",),
            vmem_limit_bytes=vmem_limit,
        ),
        cost_estimate=cost,
    )(x2d, w_ls_t, b_ls, w_sh_t, b_sh)

    log_scale = ls2d.reshape(batch, seq, out_dim)
    shift = sh2d.reshape(batch, seq, out_dim)
    return log_scale, shift


if __name__ == "__main__":
    batch, seq = 2, 8
    in_dim, out_dim = 32, 32

    key = jax.random.PRNGKey(0)
    k_x, k_wls, k_wsh = jax.random.split(key, 3)

    # Deterministic synthetic params (kernel_initializer='none' -> small random
    # weights, zero bias).
    condition_inputs = jax.random.normal(k_x, (batch, seq, in_dim), jnp.float32)
    w_log_scale = 0.02 * jax.random.normal(k_wls, (out_dim, in_dim), jnp.float32)
    w_shift = 0.02 * jax.random.normal(k_wsh, (out_dim, in_dim), jnp.float32)
    b_log_scale = jnp.zeros((out_dim,), jnp.float32)
    b_shift = jnp.zeros((out_dim,), jnp.float32)

    # One-time weight layout prep (amortized across forward calls).
    params = prepare_base_transform_params(w_log_scale, b_log_scale,
                                           w_shift, b_shift)

    log_scale, shift = base_transform(condition_inputs, *params)
    jax.block_until_ready((log_scale, shift))

    # Pure-JAX reference (PyTorch Linear: y = x @ W^T + b)
    ref_ls = condition_inputs @ w_log_scale.T + b_log_scale
    ref_sh = condition_inputs @ w_shift.T + b_shift
    assert log_scale.shape == (batch, seq, out_dim)
    assert shift.shape == (batch, seq, out_dim)
    assert jnp.allclose(log_scale, ref_ls, atol=1e-5), "log_scale mismatch"
    assert jnp.allclose(shift, ref_sh, atol=1e-5), "shift mismatch"

    # Ragged-edge check: M = 21 is not divisible by the chosen row tile, so the
    # last grid step exercises Pallas' masked edge-block handling (no wrapper
    # padding / post-slice anymore).
    b2, s2 = 3, 7
    x2 = jax.random.normal(jax.random.PRNGKey(1), (b2, s2, in_dim), jnp.float32)
    ls2, sh2 = base_transform(x2, *params)
    jax.block_until_ready((ls2, sh2))
    assert jnp.allclose(ls2, x2 @ w_log_scale.T + b_log_scale, atol=1e-5)
    assert jnp.allclose(sh2, x2 @ w_shift.T + b_shift, atol=1e-5)

    print("KERNEL_OK")
</pallas_src>

<mosaic_0001>
module attributes {stable_mosaic.version = 11 : i64} {
  func.func @_base_transform_kernel(%arg0: i32, %arg1: memref<8x32xf32, #tpu.memory_space<vmem>>, %arg2: memref<32x32xf32, #tpu.memory_space<vmem>>, %arg3: memref<1x32xf32, #tpu.memory_space<vmem>>, %arg4: memref<32x32xf32, #tpu.memory_space<vmem>>, %arg5: memref<1x32xf32, #tpu.memory_space<vmem>>, %arg6: memref<8x32xf32, #tpu.memory_space<vmem>>, %arg7: memref<8x32xf32, #tpu.memory_space<vmem>>) attributes {dimension_semantics = [#tpu.dimension_semantics<parallel>], iteration_bounds = array<i64: 2>, scalar_prefetch = 0 : i64, scratch_operands = 0 : i64, tpu.core_type = #tpu.core_type<tc>, window_params = [{transform_indices = @transform_0, window_bounds = array<i64: 8, 32>}, {pipeline_mode = #tpu.pipeline_mode<synchronous>, transform_indices = @transform_1, window_bounds = array<i64: 32, 32>}, {pipeline_mode = #tpu.pipeline_mode<synchronous>, transform_indices = @transform_2, window_bounds = array<i64: 1, 32>}, {pipeline_mode = #tpu.pipeline_mode<synchronous>, transform_indices = @transform_3, window_bounds = array<i64: 32, 32>}, {pipeline_mode = #tpu.pipeline_mode<synchronous>, transform_indices = @transform_4, window_bounds = array<i64: 1, 32>}, {transform_indices = @transform_5, window_bounds = array<i64: 8, 32>}, {transform_indices = @transform_6, window_bounds = array<i64: 8, 32>}]} {
    %c0 = arith.constant 0 : index
    %c0_0 = arith.constant 0 : index
    %0 = vector.load %arg1[%c0, %c0_0] : memref<8x32xf32, #tpu.memory_space<vmem>>, vector<8x32xf32>
    %c0_1 = arith.constant 0 : index
    %c0_2 = arith.constant 0 : index
    %1 = vector.load %arg2[%c0_1, %c0_2] : memref<32x32xf32, #tpu.memory_space<vmem>>, vector<32x32xf32>
    %cst = arith.constant dense<0.000000e+00> : vector<8x32xf32>
    %2 = tpu.matmul %0, %1, %cst {dimension_numbers = #tpu.dot_dimension_numbers<[1], [0], [0], [1], [0, 0, 1, 1], [], []>} : vector<8x32xf32>, vector<32x32xf32>, vector<8x32xf32> -> vector<8x32xf32>
    %c0_3 = arith.constant 0 : index
    %c0_4 = arith.constant 0 : index
    %3 = vector.load %arg3[%c0_3, %c0_4] : memref<1x32xf32, #tpu.memory_space<vmem>>, vector<1x32xf32>
    %4 = vector.broadcast %3 : vector<1x32xf32> to vector<8x32xf32>
    %5 = arith.addf %2, %4 : vector<8x32xf32>
    %c0_5 = arith.constant 0 : index
    %c0_6 = arith.constant 0 : index
    %6 = vector.load %arg4[%c0_5, %c0_6] : memref<32x32xf32, #tpu.memory_space<vmem>>, vector<32x32xf32>
    %cst_7 = arith.constant dense<0.000000e+00> : vector<8x32xf32>
    %7 = tpu.matmul %0, %6, %cst_7 {dimension_numbers = #tpu.dot_dimension_numbers<[1], [0], [0], [1], [0, 0, 1, 1], [], []>} : vector<8x32xf32>, vector<32x32xf32>, vector<8x32xf32> -> vector<8x32xf32>
    %c0_8 = arith.constant 0 : index
    %c0_9 = arith.constant 0 : index
    %8 = vector.load %arg5[%c0_8, %c0_9] : memref<1x32xf32, #tpu.memory_space<vmem>>, vector<1x32xf32>
    %9 = vector.broadcast %8 : vector<1x32xf32> to vector<8x32xf32>
    %10 = arith.addf %7, %9 : vector<8x32xf32>
    %c0_10 = arith.constant 0 : index
    %c0_11 = arith.constant 0 : index
    %11 = vector.load %arg6[%c0_10, %c0_11] : memref<8x32xf32, #tpu.memory_space<vmem>>, vector<8x32xf32>
    tpu.vector_store %arg6[%c0_10, %c0_11], %5 {strides = array<i32>} : memref<8x32xf32, #tpu.memory_space<vmem>>, vector<8x32xf32>,
    %c0_12 = arith.constant 0 : index
    %c0_13 = arith.constant 0 : index
    %12 = vector.load %arg7[%c0_12, %c0_13] : memref<8x32xf32, #tpu.memory_space<vmem>>, vector<8x32xf32>
    tpu.vector_store %arg7[%c0_12, %c0_13], %10 {strides = array<i32>} : memref<8x32xf32, #tpu.memory_space<vmem>>, vector<8x32xf32>,
    return
  }
  func.func @transform_0(%arg0: i32) -> (i32, i32) {
    %c0_i32 = arith.constant 0 : i32
    %c0_i32_0 = arith.constant 0 : i32
    return %arg0, %c0_i32 : i32, i32
  }
  func.func @transform_1(%arg0: i32) -> (i32, i32) {
    %c0_i32 = arith.constant 0 : i32
    %c0_i32_0 = arith.constant 0 : i32
    %c0_i32_1 = arith.constant 0 : i32
    return %c0_i32, %c0_i32_0 : i32, i32
  }
  func.func @transform_2(%arg0: i32) -> (i32, i32) {
    %c0_i32 = arith.constant 0 : i32
    %c0_i32_0 = arith.constant 0 : i32
    %c0_i32_1 = arith.constant 0 : i32
    return %c0_i32, %c0_i32_0 : i32, i32
  }
  func.func @transform_3(%arg0: i32) -> (i32, i32) {
    %c0_i32 = arith.constant 0 : i32
    %c0_i32_0 = arith.constant 0 : i32
    %c0_i32_1 = arith.constant 0 : i32
    return %c0_i32, %c0_i32_0 : i32, i32
  }
  func.func @transform_4(%arg0: i32) -> (i32, i32) {
    %c0_i32 = arith.constant 0 : i32
    %c0_i32_0 = arith.constant 0 : i32
    %c0_i32_1 = arith.constant 0 : i32
    return %c0_i32, %c0_i32_0 : i32, i32
  }
  func.func @transform_5(%arg0: i32) -> (i32, i32) {
    %c0_i32 = arith.constant 0 : i32
    %c0_i32_0 = arith.constant 0 : i32
    return %arg0, %c0_i32 : i32, i32
  }
  func.func @transform_6(%arg0: i32) -> (i32, i32) {
    %c0_i32 = arith.constant 0 : i32
    %c0_i32_0 = arith.constant 0 : i32
    return %arg0, %c0_i32 : i32, i32
  }
}

</mosaic_0001>

<bundles_post_ra>
// kernel: tpu_custom_call.1
= control target key start
LH: loop header
LB: loop body
LE: loop exit
PB: predicated region body
PF: predicated region fallthrough
CT: control target
= control target key end

     0   :  { %12 = vsyncpa [#allocation3], 0  ;;  %s1285_s0 = inlined_call_operand.hbm [shape: f32[16,32], index: 0, kind: input, shape index: {}]   ;;  %s1286_s1 = inlined_call_operand.hbm [shape: f32[32,32], index: 1, kind: input, shape index: {}]   ;;  %s1287_s2 = inlined_call_operand.vmem [shape: f32[1,32], index: 2, kind: input, shape index: {}]   ;;  %s1288_s3 = inlined_call_operand.hbm [shape: f32[32,32], index: 3, kind: input, shape index: {}]   ;;  %s1289_s4 = inlined_call_operand.vmem [shape: f32[1,32], index: 4, kind: input, shape index: {}]   ;;  %s1290_s5 = inlined_call_operand.hbm [shape: f32[16,32], index: 5, kind: output, shape index: {0}]   ;;  %s1291_s6 = inlined_call_operand.hbm [shape: f32[16,32], index: 6, kind: output, shape index: {1}]  }
   0x1   :  { %14 = vsyncpa [#allocation3 + $0x1], 0 }
   0x2   :  { %15 = vsyncpa [#allocation6], 0 }
   0x3   :  { %16 = vsyncpa [#allocation4], 0 }
   0x4   :  { %18 = vsyncpa [#allocation4 + $0x1], 0 }
   0x5   :  { %19 = vsyncpa [#allocation10], 0 }
   0x6   :  { %21 = vsyncpa [#allocation10 + $0x1], 0  ;;  %s1008_s21 = smov 0   ;;  %s1010_s22 = smov 0  }
   0x7   :  { %s1012_s23 = smov 0   ;;  %s1014_s24 = smov 0  }
   0x8 LB: > { %s1029_s25 = sadd.s32 4294967295, %s961_s24   ;;  %s629_s26 = sadd.s32 4294967294, %s961_s24   ;;  %s961_s24 = sphi %s1014_s24, %s1311_s24   ;;  %s957_s23 = sphi %s1012_s23, %s1310_s23   ;;  %s953_s22 = sphi %s1010_s22, %s1309_s22   ;;  %s949_s21 = sphi %s1008_s21, %s1308_s21  }
   0x9   : > { %p47_p0 = scmp.ne.s32.totalorder %s953_s22, %s949_s21  ;;  %p1292_p1 = scmp.eq.s32.totalorder %s1029_s25, 0 }
   0xa   : > { %p161_p3 = scmp.eq.s32.totalorder %s629_s26, 1  ;;  %p630_p5 = scmp.ge.s32.totalorder %s961_s24, 1 }
   0xb   : > { %p1038_p4 = por %p1292_p1, %p47_p0  ;;  %p194_p7 = scmp.lt.s32.totalorder %s961_s24, 3 }
   0xc   : > { %p1043_p6 = por %p161_p3, %p47_p0  ;;  %s963_s30 = smov [#allocation5]  }
   0xd   : > { %s1295_s27 = scalar_select %p1038_p4, 1, 0 }
   0xe   : > { %s1296_s28 = scalar_select %p1043_p6, 1, 0 }
   0xf   : > { %p1048_p8 = pnand %p630_p5, %p194_p7  ;;  %s206_s7 = sshll.u32 %s963_s30, 4  ;;  %s1052_s7 = int_to_ptr.vmem [resolvable:$true] %s206_s7 }
  0x10   : > { %s964_s9 = smov [#allocation7]   ;;  %s773_s13 = scalar_lea.hbm %s1286_s1, 512 }
  0x11   : > { %p710_p9 = pneg %p1048_p8  ;;  %s222_s10 = sshll.u32 %s964_s9, 4  ;;  %s1063_s10 = int_to_ptr.vmem [resolvable:$true] %s222_s10 }
  0x12   : > { %p774_p12 = scmp.ne.s32.totalorder %s1286_s1, %s773_s13  ;;  %p780_p5 = scmp.lt.u32.totalorder %s773_s13, %s1286_s1 }
  0x13   : > { %p1059_p11 = pnand %p710_p9, %p1292_p1 }
  0x15   : > { %p775_p13 = pneg %p1059_p11 }
  0x17   : > { %p776_p0 = pnand %p775_p13, %p774_p12 }
  0x19   : > { %p777_p3 = pneg %p776_p0 }
  0x1b   : > { %p782_p7 = pnand %p780_p5, %p777_p3 }
  0x1d   : > { %785 = shalt.err (!%p782_p7)
}
  0x1e   : > { %s786_s18 = scalar_lea.vmem %s1052_s7, 512  ;;  %p794_p2 = scmp.lt.s32.totalorder %s1052_s7, %s1052_s7 }
  0x1f   : > { %p787_p9 = scmp.ne.s32.totalorder %s1052_s7, %s786_s18  ;;  %p795_p12 = scmp.lt.s32.totalorder %s786_s18, %s786_s18 }
  0x21   : > { %p789_p10 = pnand %p787_p9, %p775_p13  ;;  %p796_p0 = por %p795_p12, %p794_p2 }
  0x23   : > { %p790_p1 = pneg %p789_p10 }
  0x25   : > { %p797_p6 = pnand %p796_p0, %p790_p1 }
  0x27   : > { %800 = shalt.err (!%p797_p6)
}
  0x28   : > { %s965_s19 = smov 128   ;;  %s966_s20 = smov 8  }
  0x29   : > { %713 = dma.hbm_to_vmem [thread:$0]  (!%p1059_p11), %s1286_s1, 512, %s1052_s7, [#allocation6], %s965_s19, %s965_s19, %s966_s20  }
  0x2a   : > { %s801_s12 = scalar_lea.hbm %s1288_s3, 512 }
  0x2b   : > { %p802_p2 = scmp.ne.s32.totalorder %s1288_s3, %s801_s12  ;;  %p808_p10 = scmp.lt.u32.totalorder %s801_s12, %s1288_s3 }
  0x2d   : > { %p804_p1 = pnand %p802_p2, %p775_p13 }
  0x2f   : > { %p805_p6 = pneg %p804_p1 }
  0x31   : > { %p810_p3 = pnand %p808_p10, %p805_p6 }
  0x33   : > { %813 = shalt.err (!%p810_p3)
}
  0x34   : > { %s814_s7 = scalar_lea.vmem %s1063_s10, 512  ;;  %p822_p12 = scmp.lt.s32.totalorder %s1063_s10, %s1063_s10 }
  0x35   : > { %p815_p5 = scmp.ne.s32.totalorder %s1063_s10, %s814_s7  ;;  %p823_p0 = scmp.lt.s32.totalorder %s814_s7, %s814_s7 }
  0x37   : > { %p817_p7 = pnand %p815_p5, %p775_p13  ;;  %p824_p2 = por %p823_p0, %p822_p12 }
  0x39   : > { %p818_p9 = pneg %p817_p7 }
  0x3b   : > { %p825_p1 = pnand %p824_p2, %p818_p9 }
  0x3d   : > { %828 = shalt.err (!%p825_p1)
}
  0x3e   : > { %716 = dma.hbm_to_vmem [thread:$0]  (!%p1059_p11), %s1288_s3, 512, %s1063_s10, [#allocation6], %s965_s19, %s965_s19, %s966_s20  }
  0x3f   : > { %s1118_s26 = sadd.s32 1, %s961_s24   ;;  %s34_s8 = sadd.s32 1, %s957_s23 }
  0x40   : > { %s31_s30 = ssub.s32 %s961_s24, %s1118_s26  ;;  %p41_p13 = scmp.ne.s32.totalorder %s957_s23, %s953_s22 }
  0x41   : > { %p32_p6 = scmp.eq.s32.totalorder %s31_s30, 0  ;;  %p42_p10 = scmp.eq.s32.totalorder %s961_s24, 0 }
  0x42   : > { %p1299_p3 = scmp.eq.s32.totalorder %s1029_s25, 1  ;;  %p730_p7 = scmp.lt.s32.totalorder %s961_s24, 2 }
  0x43   : > { %s1134_s11 = scalar_select %p32_p6, %s957_s23, %s34_s8  }
  0x44   : > { %p1128_p5 = por %p1299_p3, %p41_p13  ;;  %p43_p9 = por %p42_p10, %p41_p13 }
  0x45   : > { %s239_s12 = sand.u32 1, %s957_s23   ;;  %s635_s10 = sshll.u32 %s961_s24, 7 }
  0x46   : > { %s1300_s9 = scalar_select %p1128_p5, 1, 0 }
  0x47   : > { %s634_s13 = sshll.u32 %s239_s12, 3  ;;  %s1141_s14 = scalar_lea.hbm %s1285_s0, %s635_s10 }
  0x48   : > { %s243_s15 = scalar_lea.vmem [#allocation2], %s634_s13  ;;  %p1145_p11 = pnand %p730_p7, %p43_p9 }
  0x49   : > { %s250_s16 = sshll.u32 %s243_s15, 4  ;;  %s240_s17 = scalar_lea.sflag [#allocation3], %s239_s12  ;;  %s1143_s16 = int_to_ptr.vmem [resolvable:$true] %s250_s16 }
  0x4a   : > { %s829_s18 = scalar_lea.hbm %s1141_s14, 128  ;;  %p831_p0 = pneg %p1145_p11 }
  0x4b   : > { %p830_p12 = scmp.ne.s32.totalorder %s1141_s14, %s829_s18  ;;  %s834_s13 = scalar_lea.hbm %s1285_s0, 256 }
  0x4c   : > { %p835_p13 = scmp.lt.u32.totalorder %s1141_s14, %s1285_s0  ;;  %p836_p6 = scmp.lt.u32.totalorder %s834_s13, %s829_s18 }
  0x4d   : > { %p832_p2 = pnand %p831_p0, %p830_p12  ;;  %p838_p3 = scmp.lt.u32.totalorder %s829_s18, %s1141_s14 }
  0x4e   : > { %p837_p10 = por %p836_p6, %p835_p13 }
  0x4f   : > { %p833_p1 = pneg %p832_p2 }
  0x50   : > { %p839_p7 = por %p838_p3, %p837_p10 }
  0x52   : > { %p840_p9 = pnand %p839_p7, %p833_p1 }
  0x54   : > { %843 = shalt.err (!%p840_p9)
}
  0x55   : > { %s844_s12 = scalar_lea.vmem %s1143_s16, 128  ;;  %s967_s20 = smov [#allocation2]  }
  0x56   : > { %p845_p12 = scmp.ne.s32.totalorder %s1143_s16, %s844_s12  ;;  %s849_s15 = sshll.u32 %s967_s20, 4  ;;  %s850_s15 = int_to_ptr.vmem [resolvable:$false] %s849_s15 }
  0x57   : > { %s851_s8 = scalar_lea.vmem %s850_s15, 256  ;;  %p852_p4 = scmp.lt.s32.totalorder %s1143_s16, %s850_s15 }
  0x58   : > { %p847_p2 = pnand %p845_p12, %p831_p0  ;;  %p853_p13 = scmp.lt.s32.totalorder %s851_s8, %s844_s12 }
  0x5a   : > { %p848_p5 = pneg %p847_p2  ;;  %p854_p6 = por %p853_p13, %p852_p4 }
  0x5c   : > { %p855_p10 = pnand %p854_p6, %p848_p5 }
  0x5e   : > { %858 = shalt.err (!%p855_p10)
}
  0x5f   : > { %720 = dma.hbm_to_vmem [thread:$0]  (!%p1145_p11), %s1141_s14, 128, %s1143_s16, %s240_s17  }
  0x60   : > { %259 = sbr.rel (%p1048_p8) target bundleno = 368 (0x170), region = 40  ;;  %s1177_s18 = sand.u32 (!%p1048_p8), 1, %s953_s22  }
  0x61   : > { %s1180_s30 = sshll.u32 (!%p1048_p8), %s1177_s18, 3  ;;  %s262_s13 = scalar_lea.sflag (!%p1048_p8), [#allocation3], %s1177_s18 }
  0x62   : > { %s265_s10 = scalar_lea.vmem (!%p1048_p8), [#allocation2], %s1180_s30  ;;  %p1302_p4 = scmp.ne.s32.totalorder (!%p1048_p8), %s1295_s27, 0 }
  0x67   : > { %932 = dma.done.wait (%p1302_p4), %s262_s13, 128  }
  0x68   : > { %934 = vsyncadd (%p1302_p4), %s262_s13, 4294967168  ;;  %p1303_p5 = scmp.eq.s32.totalorder %s1029_s25, 0 }
  0x6a   : > { %936 = dma.done.wait (%p1303_p5), [#allocation6], 1024   ;;  %p1304_p8 = pmov %p1303_p5 }
  0x6b   : > { %v968_v0 = vmov 0.0|0.0   ;;  %vm969_vm0 = vmmov 0   ;;  %v970_v1 = vmov 0.0   ;;  %v308_v2 = vld [vmem:[#allocation5] sm:$0xff]  ;;  %v309_v3 = vld [vmem:[#allocation5 + $0x8] sm:$0xff]  ;;  %v310_v7 = vld [vmem:[#allocation5 + $0x10] sm:$0xff] }
  0x6c   : > { %938 = vsyncadd (%p1304_p8), [#allocation6], 4294966272  ;;  %684 = vmatprep.subr.bf16.mxu0 %v968_v0  ;;  %690 = vmatprep.subr.bf16.mxu1 %v968_v0  ;;  %v393_v4 = vld [vmem:[#allocation7] sm:$0xff]  ;;  %v685_v5 = vpack.c.bf16 %v309_v3, %v308_v2  ;;  %v394_v6 = vld [vmem:[#allocation7 + $0x8] sm:$0xff]  ;;  %vm319_vm1 = vcmask 261120   ;;  %s648_s27 = sshll.u32 %s1029_s25, 7 }
  0x6d   : > { %670 = vmatprep.mubr.msk.f32.mxu0 %vm969_vm0, %v970_v1  ;;  %681 = vmatprep.mubr.msk.f32.mxu1 %vm969_vm0, %v970_v1  ;;  %v311_v8 = vld [vmem:[#allocation5 + $0x18] sm:$0xff]  ;;  %v691_v9 = vpack.c.bf16 %v394_v6, %v393_v4  ;;  %v395_v10 = vld [vmem:[#allocation7 + $0x10] sm:$0xff]  ;;  %s299_s16 = scalar_lea.vmem [#allocation8], %s1180_s30  ;;  %s306_s12 = scalar_lea.vmem [#allocation9], %s1180_s30 }
  0x6e   : > { %v396_v11 = vld [vmem:[#allocation7 + $0x18] sm:$0xff]  ;;  %686 = vmatpush3.bf16.msra.mxu0 %v685_v5  ;;  %v688_v12 = vpack.c.bf16 %v311_v8, %v310_v7  ;;  %v642_v15 = vld [vmem:[%s1287_s2] ss:$0 sm:$0xff]  ;;  %s495_s7 = sshll.u32 %s299_s16, 4  ;;  %s508_s20 = sshll.u32 %s306_s12, 4  ;;  %s1210_s7 = int_to_ptr.vmem [resolvable:$true] %s495_s7  ;;  %s1217_s20 = int_to_ptr.vmem [resolvable:$true] %s508_s20 }
  0x6f   : > { %692 = vmatpush3.bf16.msra.mxu1 %v691_v9  ;;  %687 = vmatprep.subr.bf16.mxu0 %v968_v0  ;;  %v694_v13 = vpack.c.bf16 %v396_v11, %v395_v10  ;;  %v307_v14 = vld [vmem:[%s265_s10] sm:$0xff]  ;;  %s1208_s25 = scalar_lea.hbm %s1290_s5, %s648_s27  ;;  %s1215_s29 = scalar_lea.hbm %s1291_s6, %s648_s27 }
  0x70   : > { %693 = vmatprep.subr.bf16.mxu1 %v968_v0  ;;  %v644_v16 = vld [vmem:[%s1289_s4] ss:$0 sm:$0xff]  ;;  %s477_s14 = scalar_lea.sflag [#allocation4], %s1177_s18  ;;  %s859_s17 = scalar_lea.vmem %s1210_s7, 128 }
  0x71   : > { %p860_p11 = scmp.ne.s32.totalorder %s1210_s7, %s859_s17  ;;  %p1305_p0 = scmp.ne.s32.totalorder %s1300_s9, 0 }
  0x72   : > { %689 = vmatpush3.bf16.msra.mxu0 %v688_v12  ;;  %s971_s19 = smov [#allocation8]  }
  0x73   : > { %695 = vmatpush3.bf16.msra.mxu1 %v694_v13  ;;  %p861_p1 = pnand %p860_p11, %p1305_p0  ;;  %s863_s15 = sshll.u32 %s971_s19, 4  ;;  %s864_s15 = int_to_ptr.vmem [resolvable:$false] %s863_s15 }
  0x74   : > { %s865_s8 = scalar_lea.vmem %s864_s15, 256  ;;  %p866_p7 = scmp.lt.s32.totalorder %s1210_s7, %s864_s15 }
  0x75   : > { %671 = vmatmul.mubr.msk.f32.vlgmr.msra.gmra.mrb[0].mxu0 %vm319_vm1, %v307_v14  ;;  %p862_p3 = pneg %p861_p1  ;;  %p867_p9 = scmp.lt.s32.totalorder %s865_s8, %s859_s17 }
  0x76   : > { %682 = vmatmul.mubr.msk.f32.vlgmr.msra.gmra.mrb[0].mxu1 %vm319_vm1, %v307_v14 }
  0x77   : > { %p868_p12 = por %p867_p9, %p866_p7 }
  0x79   : > { %p869_p2 = pnand %p868_p12, %p862_p3 }
 0x148   : > { %v389_v17 = vpop.f32.mrb[0].mxu0 }
 0x149   : > { %v390_v18 = vadd.f32 %v642_v15, %v389_v17  ;;  %v470_v19 = vpop.f32.mrb[0].mxu1  ;;  %v672_v20 = vpop.f32.mrb[1].mxu0 }
 0x14a   : > { %v471_v21 = vadd.f32 %v644_v16, %v470_v19  ;;  %v683_v22 = vpop.f32.mrb[1].mxu1 }
 0x14b   : > { %474 = vst.msk [vmem:[%s299_s16] sm:$0xff] %vm319_vm1, %v390_v18 }
 0x14c   : > { %872 = shalt.err (!%p869_p2)
}
 0x14d   : > { %s873_s27 = scalar_lea.hbm %s1208_s25, 128  ;;  %s877_s10 = scalar_lea.hbm %s1290_s5, 256 }
 0x14e   : > { %p874_p13 = scmp.ne.s32.totalorder %s1208_s25, %s873_s27  ;;  %p878_p4 = scmp.lt.u32.totalorder %s1208_s25, %s1290_s5 }
 0x14f   : > { %p879_p5 = scmp.lt.u32.totalorder %s877_s10, %s873_s27  ;;  %p881_p11 = scmp.lt.u32.totalorder %s873_s27, %s1208_s25 }
 0x150   : > { %p875_p6 = pnand %p874_p13, %p1305_p0 }
 0x151   : > { %p880_p8 = por %p879_p5, %p878_p4 }
 0x152   : > { %p876_p10 = pneg %p875_p6 }
 0x153   : > { %p882_p1 = por %p881_p11, %p880_p8 }
 0x155   : > { %p883_p3 = pnand %p882_p1, %p876_p10 }
 0x157   : > { %886 = shalt.err (!%p883_p3)
}
 0x158   : > { %706 = dma.vmem_to_hbm [thread:$0]  (%p1305_p0), %s1210_s7, 128, %s1208_s25, %s477_s14   ;;  %475 = vst.msk [vmem:[%s306_s12] sm:$0xff] %vm319_vm1, %v471_v21 }
 0x159   : > { %s482_s17 = scalar_lea.sflag [#allocation10], %s1177_s18  ;;  %s887_s8 = scalar_lea.vmem %s1217_s20, 128 }
 0x15a   : > { %p888_p7 = scmp.ne.s32.totalorder %s1217_s20, %s887_s8  ;;  %s972_s27 = smov [#allocation9]  }
 0x15b   : > { %s891_s16 = sshll.u32 %s972_s27, 4  ;;  %s892_s16 = int_to_ptr.vmem [resolvable:$false] %s891_s16 }
 0x15c   : > { %p889_p9 = pnand %p888_p7, %p1305_p0  ;;  %s893_s13 = scalar_lea.vmem %s892_s16, 256 }
 0x15d   : > { %p894_p2 = scmp.lt.s32.totalorder %s1217_s20, %s892_s16  ;;  %p895_p13 = scmp.lt.s32.totalorder %s893_s13, %s887_s8 }
 0x15e   : > { %p890_p12 = pneg %p889_p9 }
 0x15f   : > { %p896_p6 = por %p895_p13, %p894_p2 }
 0x161   : > { %p897_p10 = pnand %p896_p6, %p890_p12 }
 0x163   : > { %900 = shalt.err (!%p897_p10)
}
 0x164   : > { %s901_s18 = scalar_lea.hbm %s1215_s29, 128  ;;  %s905_s12 = scalar_lea.hbm %s1291_s6, 256 }
 0x165   : > { %p902_p4 = scmp.ne.s32.totalorder %s1215_s29, %s901_s18  ;;  %p906_p11 = scmp.lt.u32.totalorder %s1215_s29, %s1291_s6 }
 0x166   : > { %p907_p1 = scmp.lt.u32.totalorder %s905_s12, %s901_s18  ;;  %p909_p7 = scmp.lt.u32.totalorder %s901_s18, %s1215_s29 }
 0x167   : > { %p903_p5 = pnand %p902_p4, %p1305_p0 }
 0x168   : > { %p908_p3 = por %p907_p1, %p906_p11 }
 0x169   : > { %p904_p8 = pneg %p903_p5 }
 0x16a   : > { %p910_p9 = por %p909_p7, %p908_p3 }
 0x16c   : > { %p911_p12 = pnand %p910_p9, %p904_p8 }
 0x16e   : > { %914 = shalt.err (!%p911_p12)
}
 0x16f   : > { %707 = dma.vmem_to_hbm [thread:$0]  (%p1305_p0), %s1217_s20, 128, %s1215_s29, %s482_s17  }
 0x170 PF: > { %s520_s10 = sand.u32 1, %s949_s21   ;;  %p1306_p2 = scmp.ne.s32.totalorder %s1296_s28, 0 }
 0x171   : > { %p1307_p13 = scmp.ge.s32.totalorder %s961_s24, 2  ;;  %s521_s19 = scalar_lea.sflag [#allocation4], %s520_s10 }
 0x173   : > { %p722_p6 = pnand %p1307_p13, %p1306_p2 }
 0x175   : > { %940 = dma.done.wait (!%p722_p6), %s521_s19, 128  }
 0x176   : > { %942 = vsyncadd (!%p722_p6), %s521_s19, 4294967168  ;;  %s530_s15 = scalar_lea.sflag [#allocation10], %s520_s10 }
 0x177   : > { %944 = dma.done.wait (!%p722_p6), %s530_s15, 128  }
 0x178   : > { %946 = vsyncadd (!%p722_p6), %s530_s15, 4294967168  ;;  %p24_p0 = scmp.ge.s32.totalorder %s1118_s26, 4   ;;  %s1308_s21 = smov %s953_s22 }
 0x179   : > { %s1309_s22 = smov %s957_s23  ;;  %s1310_s23 = smov %s1134_s11 }
 0x17a   : > { %s1311_s24 = smov %s1118_s26  ;;  %26 = sbr.rel (!%p24_p0) target bundleno = 8 (0x8), region = 110 }
 0x181   :  { %535 = vsyncpa [#allocation3], 1 }
 0x182   :  { %537 = vsyncpa [#allocation3 + $0x1], 1 }
 0x183   :  { %538 = vsyncpa [#allocation6], 1 }
 0x184   :  { %539 = vsyncpa [#allocation4], 1 }
 0x185   :  { %541 = vsyncpa [#allocation4 + $0x1], 1 }
 0x186   :  { %542 = vsyncpa [#allocation10], 1 }
 0x187   :  { %544 = vsyncpa [#allocation10 + $0x1], 1 }

</bundles_post_ra>
